<compile_context>
chip_gen: v7x
topology: tpu7x:2x2x1
jax: 0.10.0
libtpu: 0.0.40
codegen_flags: <defaults>
</compile_context>

<pallas_src>
import functools

import jax
import jax.numpy as jnp
from jax.experimental import pallas as pl
from jax.experimental.pallas import tpu as pltpu


def _minus_one_kernel(x_ref, o_ref):
    # Single VPU subtract on the whole VMEM tile; full-lane-width unmasked stores.
    o_ref[...] = x_ref[...] - jnp.asarray(1, dtype=x_ref.dtype)


# Lane widths (multiples of 128), widest first; picked so the flatten->2D
# reshape is exact (copy-free) and stores are full lane width.
_LANE_CANDIDATES = (2048, 1024, 512, 384, 256, 128)


def _round_up(a: int, b: int) -> int:
    return ((a + b - 1) // b) * b


def _sublane(dtype) -> int:
    # Natural second-to-last tile multiple per dtype packing (f32:8, bf16:16, int8:32).
    return {4: 8, 2: 16, 1: 32}.get(jnp.dtype(dtype).itemsize, 8)


@functools.lru_cache(maxsize=1)
def _chip_config():
    """Per-generation (tile_bytes, vmem_limit_bytes_or_None, num_tensorcores)."""
    kind = ""
    try:
        kind = jax.devices()[0].device_kind.lower()
    except Exception:
        pass
    if "v7" in kind:
        # 3.2 TB/s HBM: bigger tiles amortize the ~0.35 us/step overhead; 2 TCs.
        return (5 * 1024 * 1024, 32 * 1024 * 1024, 2)
    if "v6" in kind:
        # 32 MiB default scoped VMEM; 4 x 4 MiB = 16 MiB live.
        return (4 * 1024 * 1024, None, 1)
    # v5e (and conservative default): 16 MiB default scoped VMEM -> 4 x 3 MiB = 12 MiB.
    return (3 * 1024 * 1024, None, 1)


def _choose_tile_m(rows: int, lane: int, dtype) -> int:
    tile_bytes, _, num_tc = _chip_config()
    sub = _sublane(dtype)
    if rows <= sub:
        # Single block spanning the full (small) row extent.
        return rows
    itemsize = jnp.dtype(dtype).itemsize
    tm = max(sub, (tile_bytes // (lane * itemsize)) // sub * sub)
    tm = min(tm, _round_up(rows, sub))
    # Only force extra grid steps on multi-TensorCore chips, and only when the
    # tensor is large enough (>= ~2 MiB) that splitting is worth the per-step
    # overhead.  Target 2+ steps per core so each core's pipeline stays warm.
    total_bytes = rows * lane * itemsize
    if num_tc > 1 and total_bytes >= (2 << 20):
        min_steps = 2 * num_tc
        if pl.cdiv(rows, tm) < min_steps:
            tm = max(sub, _round_up(pl.cdiv(rows, min_steps), sub))
    return tm


def _minus_one_2d(x2: jax.Array) -> jax.Array:
    rows, lane = x2.shape
    _, vmem_limit, _ = _chip_config()
    tm = _choose_tile_m(rows, lane, x2.dtype)
    grid = (pl.cdiv(rows, tm),)
    itemsize = jnp.dtype(x2.dtype).itemsize
    compiler_params = pltpu.CompilerParams(
        dimension_semantics=("parallel",),
        vmem_limit_bytes=vmem_limit,
    )
    return pl.pallas_call(
        _minus_one_kernel,
        out_shape=jax.ShapeDtypeStruct((rows, lane), x2.dtype),
        grid=grid,
        in_specs=[pl.BlockSpec((tm, lane), lambda i: (i, 0))],
        out_specs=pl.BlockSpec((tm, lane), lambda i: (i, 0)),
        compiler_params=compiler_params,
        cost_estimate=pl.CostEstimate(
            flops=rows * lane,
            transcendentals=0,
            bytes_accessed=2 * rows * lane * itemsize,
        ),
    )(x2)


def minus_one(x: jax.Array) -> jax.Array:
    """Compute x - 1 with a Pallas TPU kernel (elementwise, any shape)."""
    orig_shape = x.shape
    total = x.size
    if total == 0:
        return (x - jnp.asarray(1, dtype=x.dtype)).reshape(orig_shape)

    # Fast path: pick the widest lane width that divides the total element
    # count so the flatten->2D reshape is exact (copy-free) and every vector
    # store is full lane width.
    if total % 128 == 0:
        flat = x.reshape(-1)  # contiguous flatten: metadata-only reshape
        for cand in _LANE_CANDIDATES:
            if total % cand == 0:
                out2 = _minus_one_2d(flat.reshape(total // cand, cand))
                return out2.reshape(orig_shape)

    # Non-128-multiple totals: a pad->kernel->slice round trip would move ~3x
    # the minimum HBM bytes, so just let XLA do the single elementwise op.
    return x - jnp.asarray(1, dtype=x.dtype)


if __name__ == "__main__":
    key = jax.random.PRNGKey(0)
    k0, k1 = jax.random.split(key)

    # Small NCHW-like input consistent with the generic elementwise module.
    x = jax.random.normal(k0, (2, 4, 16, 16), dtype=jnp.float32)
    y = minus_one(x)
    jax.block_until_ready(y)
    y_ref = x - 1.0
    assert y.shape == x.shape and y.dtype == x.dtype
    assert jnp.allclose(y, y_ref, atol=0, rtol=0), "mismatch vs reference (aligned path)"

    # Larger aligned case to exercise the tiled multi-step grid path.
    x_big = jax.random.normal(k1, (8, 512, 512), dtype=jnp.float32)
    y_big = minus_one(x_big)
    jax.block_until_ready(y_big)
    assert jnp.allclose(y_big, x_big - 1.0, atol=0, rtol=0), "mismatch vs reference (tiled path)"

    # Odd-sized input takes the plain-XLA fallback path.
    x_odd = jax.random.normal(k1, (3, 5, 7), dtype=jnp.float32)
    y_odd = minus_one(x_odd)
    jax.block_until_ready(y_odd)
    assert y_odd.shape == x_odd.shape and y_odd.dtype == x_odd.dtype
    assert jnp.allclose(y_odd, x_odd - 1.0, atol=0, rtol=0), "mismatch vs reference (fallback path)"

    print("KERNEL_OK")
</pallas_src>

<mosaic_0001>
module attributes {stable_mosaic.version = 11 : i64} {
  func.func @_minus_one_kernel(%arg0: i32, %arg1: memref<1x2048xf32, #tpu.memory_space<vmem>>, %arg2: memref<1x2048xf32, #tpu.memory_space<vmem>>) attributes {dimension_semantics = [#tpu.dimension_semantics<parallel>], iteration_bounds = array<i64: 1>, scalar_prefetch = 0 : i64, scratch_operands = 0 : i64, tpu.core_type = #tpu.core_type<tc>, window_params = [{transform_indices = @transform_0, window_bounds = array<i64: 1, 2048>}, {transform_indices = @transform_1, window_bounds = array<i64: 1, 2048>}]} {
    %c0 = arith.constant 0 : index
    %c0_0 = arith.constant 0 : index
    %0 = vector.load %arg1[%c0, %c0_0] : memref<1x2048xf32, #tpu.memory_space<vmem>>, vector<1x2048xf32>
    %cst = arith.constant 1.000000e+00 : f32
    %1 = vector.broadcast %cst : f32 to vector<1x2048xf32>
    %2 = arith.subf %0, %1 : vector<1x2048xf32>
    %c0_1 = arith.constant 0 : index
    %c0_2 = arith.constant 0 : index
    %3 = vector.load %arg2[%c0_1, %c0_2] : memref<1x2048xf32, #tpu.memory_space<vmem>>, vector<1x2048xf32>
    tpu.vector_store %arg2[%c0_1, %c0_2], %2 {strides = array<i32>} : memref<1x2048xf32, #tpu.memory_space<vmem>>, vector<1x2048xf32>,
    return
  }
  func.func @transform_0(%arg0: i32) -> (i32, i32) {
    %c0_i32 = arith.constant 0 : i32
    %c0_i32_0 = arith.constant 0 : i32
    return %arg0, %c0_i32 : i32, i32
  }
  func.func @transform_1(%arg0: i32) -> (i32, i32) {
    %c0_i32 = arith.constant 0 : i32
    %c0_i32_0 = arith.constant 0 : i32
    return %arg0, %c0_i32 : i32, i32
  }
}

</mosaic_0001>

<bundles_post_ra>
// kernel: tpu_custom_call.1
= control target key start
LH: loop header
LB: loop body
LE: loop exit
PB: predicated region body
PF: predicated region fallthrough
CT: control target
= control target key end

     0   :  { %6 = vsyncpa [#allocation3], 0  ;;  %s130_s0 = inlined_call_operand.hbm [shape: f32[1,2048], index: 0, kind: input, shape index: {}]   ;;  %s131_s1 = inlined_call_operand.hbm [shape: f32[1,2048], index: 1, kind: output, shape index: {}]  }
   0x1   :  { %7 = vsyncpa [#allocation4], 0  ;;  %s94_s6 = smov [#allocation2]   ;;  %s46_s10 = scalar_lea.hbm %s130_s0, 256 }
   0x2   :  { %s14_s7 = sshll.u32 %s94_s6, 4  ;;  %p47_p0 = scmp.ne.s32.totalorder %s130_s0, %s46_s10  ;;  %s15_s7 = int_to_ptr.vmem [resolvable:$true] %s14_s7 }
   0x3   :  { %p50_p1 = scmp.lt.u32.totalorder %s46_s10, %s130_s0 }
   0x5   :  { %p52_p2 = pnand %p50_p1, %p47_p0 }
   0x7   :  { %55 = shalt.err (!%p52_p2)
}
   0x8   :  { %s56_s15 = scalar_lea.vmem %s15_s7, 256  ;;  %p61_p4 = scmp.lt.s32.totalorder %s15_s7, %s15_s7 }
   0x9   :  { %p57_p3 = scmp.ne.s32.totalorder %s15_s7, %s56_s15  ;;  %p62_p5 = scmp.lt.s32.totalorder %s56_s15, %s56_s15 }
   0xb   :  { %p63_p6 = por %p62_p5, %p61_p4 }
   0xd   :  { %p64_p7 = pnand %p63_p6, %p57_p3 }
   0xf   :  { %67 = shalt.err (!%p64_p7)
}
  0x10   :  { %17 = dma.hbm_to_vmem [thread:$0]  %s130_s0, 256, %s15_s7, [#allocation3]  }
  0x11   :  { %90 = dma.done.wait [#allocation3], 256  }
  0x12   :  { %91 = vsyncadd [#allocation3], 4294967040  ;;  %s95_s18 = smov [#allocation5]   ;;  %v21_v0 = vld [vmem:[#allocation2] sm:$0xff]  ;;  %v22_v1 = vld [vmem:[#allocation2 + $0x8] sm:$0xff] }
  0x13   :  { %s33_s19 = sshll.u32 %s95_s18, 4  ;;  %v42_v2 = vadd.f32 -1.0, %v21_v0  ;;  %v43_v3 = vadd.f32 -1.0, %v22_v1  ;;  %s34_s19 = int_to_ptr.vmem [resolvable:$true] %s33_s19 }
  0x14   :  { %s68_s20 = scalar_lea.vmem %s34_s19, 256  ;;  %p73_p9 = scmp.lt.s32.totalorder %s34_s19, %s34_s19 }
  0x15   :  { %25 = vst [vmem:[#allocation5] sm:$0xff] %v42_v2  ;;  %26 = vst [vmem:[#allocation5 + $0x8] sm:$0xff] %v43_v3  ;;  %p69_p8 = scmp.ne.s32.totalorder %s34_s19, %s68_s20  ;;  %p74_p10 = scmp.lt.s32.totalorder %s68_s20, %s68_s20 }
  0x17   :  { %p75_p11 = por %p74_p10, %p73_p9 }
  0x19   :  { %p76_p12 = pnand %p75_p11, %p69_p8 }
  0x1b   :  { %79 = shalt.err (!%p76_p12)
}
  0x1c   :  { %s80_s22 = scalar_lea.hbm %s131_s1, 256 }
  0x1d   :  { %p81_p13 = scmp.ne.s32.totalorder %s131_s1, %s80_s22  ;;  %p84_p0 = scmp.lt.u32.totalorder %s80_s22, %s131_s1 }
  0x1f   :  { %p86_p1 = pnand %p84_p0, %p81_p13 }
  0x21   :  { %89 = shalt.err (!%p86_p1)
}
  0x22   :  { %36 = dma.vmem_to_hbm [thread:$0]  %s34_s19, 256, %s131_s1, [#allocation4]  }
  0x23   :  { %92 = dma.done.wait [#allocation4], 256  }
  0x24   :  { %93 = vsyncadd [#allocation4], 4294967040 }
  0x25   :  { %40 = vsyncpa [#allocation3], 1 }
  0x26   :  { %41 = vsyncpa [#allocation4], 1 }

</bundles_post_ra>
